<compile_context>
chip_gen: v7x
topology: tpu7x:2x2x1
jax: 0.10.0
libtpu: 0.0.40
codegen_flags: <defaults>
</compile_context>

<pallas_src>
import numpy as np
import jax
import jax.numpy as jnp
from jax.experimental import pallas as pl
from jax.experimental.pallas import tpu as pltpu

SAMPLES_PER_STRAND = 100
N_FFT = SAMPLES_PER_STRAND - 1          # 99
K = N_FFT // 2 + 1                      # 50 rfft bins
C = 3                                   # xyz channels
FEAT = 2 * C * K                        # 300 spectral features (real||imag per channel)
SC = N_FFT * C                          # 297 flattened spatial values per strand


# ---------------------------------------------------------------------------
# Offline constant folding (runs once per checkpoint, in float64)
# ---------------------------------------------------------------------------
def _build_dft_matrices():
    """Exact ortho-normalized rfft / irfft (n=99, dim=-2) as dense per-channel matrices."""
    s = np.arange(N_FFT)
    k = np.arange(K)
    theta = 2.0 * np.pi * np.outer(k, s) / N_FFT           # (K, S)
    scale = 1.0 / np.sqrt(N_FFT)                           # norm='ortho'
    Fr = np.cos(theta) * scale                             # rfft -> real part
    Fi = -np.sin(theta) * scale                            # rfft -> imag part
    w = np.where(k == 0, 1.0, 2.0)[None, :]                # Hermitian doubling (odd n)
    Cr = (np.cos(theta).T * scale) * w                     # irfft wrt Re(X[k])
    Ci = (-np.sin(theta).T * scale) * w                    # irfft wrt Im(X[k])
    # fold per-channel structure:  x_flat m = s*3 + c ;  feature j = k*6 + c'
    W_enc = np.zeros((SC, FEAT), np.float64)
    W_dec = np.zeros((FEAT, SC), np.float64)
    for c in range(C):
        W_enc[c::C, c::2 * C] = Fr.T
        W_enc[c::C, (c + C)::2 * C] = Fi.T
        W_dec[c::2 * C, c::C] = Cr.T
        W_dec[(c + C)::2 * C, c::C] = Ci.T
    return W_enc, W_dec


def precompute_folded_weights(mean_shape, blend_shapes, *, weight_dtype=jnp.bfloat16):
    """Fold decode(encode(x)) into out = x @ W_total + bias (exact, float64 precompute)."""
    W_enc, W_dec = _build_dft_matrices()
    mean_flat = np.asarray(mean_shape, np.float64).reshape(1, FEAT)
    blend_flat = np.asarray(blend_shapes, np.float64).reshape(-1, FEAT)
    P = blend_flat.T @ blend_flat                          # (FEAT, FEAT) projector chain
    W_total = W_enc @ (P @ W_dec)                          # (SC, SC)
    bias = (mean_flat - mean_flat @ P) @ W_dec             # (1, SC)
    return jnp.asarray(W_total, weight_dtype), jnp.asarray(bias, jnp.float32)


# ---------------------------------------------------------------------------
# Pallas kernel: one streamed batch tile -> out = x @ W_total + bias
# ---------------------------------------------------------------------------
def _strand_codec_kernel(x_ref, w_ref, b_ref, o_ref):
    """x:(TB,SC), w:(SC,SC) bf16, b:(1,SC) f32, o:(TB,SC)."""
    x = x_ref[...].astype(w_ref.dtype)                     # no-op if x is already bf16
    acc = jnp.dot(x, w_ref[...], preferred_element_type=jnp.float32)
    o_ref[...] = (acc + b_ref[...]).astype(o_ref.dtype)


def _round_up(n, m):
    return ((n + m - 1) // m) * m


def strand_codec_forward(x, w_total, bias, *, block_b=4096, out_dtype=jnp.bfloat16):
    """x: (B, 99, 3) float; returns decode(encode(x)) of shape (B, 99, 3) in out_dtype."""
    B = x.shape[0]
    x_flat = x.reshape(B, SC)                              # free (no HBM copy)

    # Batch tile: multiple of 8 sublanes, capped at ceil(B/2) so the grid has >= 2
    # steps (both v7x TensorCores get work for any B > 8).  Ragged last tile is
    # handled by Pallas boundary masking (grid = cdiv): no wrapper pad/slice copies.
    tb = min(block_b, _round_up(pl.cdiv(B, 2), 8))
    if tb >= B:
        tb = B                                             # tiny batch: single full block
    grid = (pl.cdiv(B, tb),)

    cost = pl.CostEstimate(
        flops=2 * B * SC * SC,
        transcendentals=0,
        bytes_accessed=B * SC * (x.dtype.itemsize + jnp.dtype(out_dtype).itemsize)
        + SC * SC * w_total.dtype.itemsize
        + SC * bias.dtype.itemsize,
    )

    out_flat = pl.pallas_call(
        _strand_codec_kernel,
        out_shape=jax.ShapeDtypeStruct((B, SC), out_dtype),
        grid=grid,
        in_specs=[
            # x: streamed batch tiles (double-buffered DMA overlap)
            pl.BlockSpec((tb, SC), lambda i: (i, 0)),
            # W_total / bias: resident constants, single-buffered (DMA'd once)
            pl.BlockSpec((SC, SC), lambda i: (0, 0), pipeline_mode=pl.Buffered(1)),
            pl.BlockSpec((1, SC), lambda i: (0, 0), pipeline_mode=pl.Buffered(1)),
        ],
        out_specs=pl.BlockSpec((tb, SC), lambda i: (i, 0)),
        compiler_params=pltpu.CompilerParams(
            dimension_semantics=("parallel",),             # shard batch across TCs (v7x)
            vmem_limit_bytes=40 << 20),                    # sized for v7x's 64 MiB VMEM
        cost_estimate=cost,
    )(x_flat, w_total, bias)

    return out_flat.reshape(B, N_FFT, C)


# ---------------------------------------------------------------------------
# Pure-JAX reference (real FFTs) for verification
# ---------------------------------------------------------------------------
def reference_forward(x, mean_shape, blend_shapes):
    hp = jax.lax.Precision.HIGHEST
    four = jnp.fft.rfft(x, n=N_FFT, axis=-2, norm="ortho")
    y = jnp.concatenate([four.real, four.imag], axis=-1)                   # (B, K, 6)
    d = (y - mean_shape).reshape(x.shape[0], -1)
    bf = blend_shapes.reshape(blend_shapes.shape[0], -1)
    coeff = jnp.dot(d, bf.T, precision=hp)
    z = mean_shape + jnp.einsum("bn,nkc->bkc", coeff, blend_shapes, precision=hp)
    out = jnp.fft.irfft(z[..., :C] + 1j * z[..., C:], n=N_FFT, axis=-2, norm="ortho")
    return out


if __name__ == "__main__":
    key = jax.random.PRNGKey(0)
    kx, km, kb = jax.random.split(key, 3)

    B = 12            # not a tile multiple: exercises the in-kernel ragged-tail masking
    NUM_COEFF = 8
    # deterministic synthetic "checkpoint" (shapes implied by rfft(n=99) -> (50, 6))
    x = jax.random.normal(kx, (B, N_FFT, C), jnp.float32)
    mean_shape = 0.1 * jax.random.normal(km, (K, 2 * C), jnp.float32)
    blend_shapes = 0.1 * jax.random.normal(kb, (NUM_COEFF, K, 2 * C), jnp.float32)

    w_total, bias = precompute_folded_weights(mean_shape, blend_shapes)
    out = strand_codec_forward(x, w_total, bias)
    out = jax.block_until_ready(out)

    ref = reference_forward(x, mean_shape, blend_shapes)
    assert out.shape == (B, N_FFT, C), out.shape
    out_f32 = out.astype(jnp.float32)
    max_err = float(jnp.max(jnp.abs(out_f32 - ref)))
    # bf16 weights + bf16 activations/output cap accuracy at ~1e-2 relative.
    assert jnp.allclose(out_f32, ref, atol=3e-2, rtol=3e-2), f"max abs err {max_err}"
    print("KERNEL_OK")
</pallas_src>

<mosaic_0001>
module attributes {stable_mosaic.version = 11 : i64} {
  func.func @_strand_codec_kernel(%arg0: i32, %arg1: memref<8x297xf32, #tpu.memory_space<vmem>>, %arg2: memref<297x297xbf16, #tpu.memory_space<vmem>>, %arg3: memref<1x297xf32, #tpu.memory_space<vmem>>, %arg4: memref<8x297xbf16, #tpu.memory_space<vmem>>) attributes {dimension_semantics = [#tpu.dimension_semantics<parallel>], iteration_bounds = array<i64: 2>, scalar_prefetch = 0 : i64, scratch_operands = 0 : i64, tpu.core_type = #tpu.core_type<tc>, window_params = [{transform_indices = @transform_0, window_bounds = array<i64: 8, 297>}, {pipeline_mode = #tpu.pipeline_mode<synchronous>, transform_indices = @transform_1, window_bounds = array<i64: 297, 297>}, {pipeline_mode = #tpu.pipeline_mode<synchronous>, transform_indices = @transform_2, window_bounds = array<i64: 1, 297>}, {transform_indices = @transform_3, window_bounds = array<i64: 8, 297>}]} {
    %c0 = arith.constant 0 : index
    %c0_0 = arith.constant 0 : index
    %0 = vector.load %arg1[%c0, %c0_0] : memref<8x297xf32, #tpu.memory_space<vmem>>, vector<8x297xf32>
    %1 = arith.truncf %0 : vector<8x297xf32> to vector<8x297xbf16>
    %c0_1 = arith.constant 0 : index
    %c0_2 = arith.constant 0 : index
    %2 = vector.load %arg2[%c0_1, %c0_2] : memref<297x297xbf16, #tpu.memory_space<vmem>>, vector<297x297xbf16>
    %cst = arith.constant dense<0.000000e+00> : vector<8x297xf32>
    %3 = tpu.matmul %1, %2, %cst {dimension_numbers = #tpu.dot_dimension_numbers<[1], [0], [0], [1], [0, 0, 1, 1], [], []>} : vector<8x297xbf16>, vector<297x297xbf16>, vector<8x297xf32> -> vector<8x297xf32>
    %c0_3 = arith.constant 0 : index
    %c0_4 = arith.constant 0 : index
    %4 = vector.load %arg3[%c0_3, %c0_4] : memref<1x297xf32, #tpu.memory_space<vmem>>, vector<1x297xf32>
    %5 = vector.broadcast %4 : vector<1x297xf32> to vector<8x297xf32>
    %6 = arith.addf %3, %5 : vector<8x297xf32>
    %7 = arith.truncf %6 : vector<8x297xf32> to vector<8x297xbf16>
    %c0_5 = arith.constant 0 : index
    %c0_6 = arith.constant 0 : index
    %8 = vector.load %arg4[%c0_5, %c0_6] : memref<8x297xbf16, #tpu.memory_space<vmem>>, vector<8x297xbf16>
    tpu.vector_store %arg4[%c0_5, %c0_6], %7 {strides = array<i32>} : memref<8x297xbf16, #tpu.memory_space<vmem>>, vector<8x297xbf16>,
    return
  }
  func.func @transform_0(%arg0: i32) -> (i32, i32) {
    %c0_i32 = arith.constant 0 : i32
    %c0_i32_0 = arith.constant 0 : i32
    return %arg0, %c0_i32 : i32, i32
  }
  func.func @transform_1(%arg0: i32) -> (i32, i32) {
    %c0_i32 = arith.constant 0 : i32
    %c0_i32_0 = arith.constant 0 : i32
    %c0_i32_1 = arith.constant 0 : i32
    return %c0_i32, %c0_i32_0 : i32, i32
  }
  func.func @transform_2(%arg0: i32) -> (i32, i32) {
    %c0_i32 = arith.constant 0 : i32
    %c0_i32_0 = arith.constant 0 : i32
    %c0_i32_1 = arith.constant 0 : i32
    return %c0_i32, %c0_i32_0 : i32, i32
  }
  func.func @transform_3(%arg0: i32) -> (i32, i32) {
    %c0_i32 = arith.constant 0 : i32
    %c0_i32_0 = arith.constant 0 : i32
    return %arg0, %c0_i32 : i32, i32
  }
}

</mosaic_0001>

<bundles_post_ra>
// kernel: tpu_custom_call.1
= control target key start
LH: loop header
LB: loop body
LE: loop exit
PB: predicated region body
PF: predicated region fallthrough
CT: control target
= control target key end

     0   :  { %8 = vsyncpa [#allocation3], 0  ;;  %s1525_s0 = inlined_call_operand.hbm [shape: f32[12,297], index: 0, kind: input, shape index: {}]   ;;  %s1526_s1 = inlined_call_operand.hbm [shape: bf16[297,297], index: 1, kind: input, shape index: {}]   ;;  %s1527_s2 = inlined_call_operand.vmem [shape: f32[1,297], index: 2, kind: input, shape index: {}]   ;;  %s1528_s3 = inlined_call_operand.hbm [shape: bf16[12,297], index: 3, kind: output, shape index: {}]  }
   0x1   :  { %10 = vsyncpa [#allocation3 + $0x1], 0 }
   0x2   :  { %11 = vsyncpa [#allocation6], 0 }
   0x3   :  { %12 = vsyncpa [#allocation4], 0 }
   0x4   :  { %14 = vsyncpa [#allocation4 + $0x1], 0  ;;  %s1309_s12 = smov 0   ;;  %s1311_s13 = smov 0  }
   0x5   :  { %s1313_s14 = smov 0   ;;  %s1315_s15 = smov 0  }
   0x6 LB: > { %s1330_s16 = sadd.s32 4294967295, %s1278_s15   ;;  %s893_s17 = sadd.s32 4294967294, %s1278_s15   ;;  %s1278_s15 = sphi %s1315_s15, %s1548_s15   ;;  %s1274_s14 = sphi %s1313_s14, %s1547_s14   ;;  %s1270_s13 = sphi %s1311_s13, %s1546_s13   ;;  %s1266_s12 = sphi %s1309_s12, %s1545_s12  }
   0x7   : > { %p40_p0 = scmp.ne.s32.totalorder %s1270_s13, %s1266_s12  ;;  %p1529_p1 = scmp.eq.s32.totalorder %s1330_s16, 0 }
   0x8   : > { %p112_p3 = scmp.eq.s32.totalorder %s893_s17, 1  ;;  %p894_p5 = scmp.ge.s32.totalorder %s1278_s15, 1 }
   0x9   : > { %p1339_p4 = por %p1529_p1, %p40_p0  ;;  %p119_p7 = scmp.lt.s32.totalorder %s1278_s15, 3 }
   0xa   : > { %p1344_p6 = por %p112_p3, %p40_p0  ;;  %s1280_s21 = smov [#allocation5]  }
   0xb   : > { %s1532_s18 = scalar_select %p1339_p4, 1, 0 }
   0xc   : > { %s1533_s19 = scalar_select %p1344_p6, 1, 0 }
   0xd   : > { %p1349_p8 = pnand %p894_p5, %p119_p7  ;;  %s131_s22 = sshll.u32 %s1280_s21, 4  ;;  %s1353_s22 = int_to_ptr.vmem [resolvable:$true] %s131_s22 }
   0xe   : > { %s1365_s24 = sadd.s32 1, %s1278_s15   ;;  %s27_s25 = sadd.s32 1, %s1274_s14 }
   0xf   : > { %s1534_s20 = scalar_select %p1349_p8, 1, 0 }
  0x10   : > { %p1019_p9 = pneg %p1349_p8  ;;  %s24_s26 = ssub.s32 %s1278_s15, %s1365_s24 }
  0x11   : > { %s1150_s29 = scalar_lea.hbm %s1526_s1, 7296 }
  0x12   : > { %p1360_p11 = pnand %p1019_p9, %p1529_p1  ;;  %p1151_p12 = scmp.ne.s32.totalorder %s1526_s1, %s1150_s29 }
  0x13   : > { %p1157_p5 = scmp.lt.u32.totalorder %s1150_s29, %s1526_s1 }
  0x14   : > { %p1152_p13 = pneg %p1360_p11 }
  0x16   : > { %p1153_p0 = pnand %p1152_p13, %p1151_p12 }
  0x18   : > { %p1154_p3 = pneg %p1153_p0 }
  0x1a   : > { %p1159_p7 = pnand %p1157_p5, %p1154_p3 }
  0x1c   : > { %1162 = shalt.err (!%p1159_p7)
}
  0x1d   : > { %s1163_s7 = scalar_lea.vmem %s1353_s22, 7296  ;;  %p1171_p2 = scmp.lt.s32.totalorder %s1353_s22, %s1353_s22 }
  0x1e   : > { %p1164_p9 = scmp.ne.s32.totalorder %s1353_s22, %s1163_s7  ;;  %p1172_p6 = scmp.lt.s32.totalorder %s1163_s7, %s1163_s7 }
  0x20   : > { %p1166_p10 = pnand %p1164_p9, %p1152_p13  ;;  %p1173_p4 = por %p1172_p6, %p1171_p2 }
  0x22   : > { %p1167_p1 = pneg %p1166_p10 }
  0x24   : > { %p1174_p8 = pnand %p1173_p4, %p1167_p1 }
  0x26   : > { %1177 = shalt.err (!%p1174_p8)
}
  0x27   : > { %s1281_s8 = smov 192   ;;  %s1282_s9 = smov 12  }
  0x28   : > { %1022 = dma.hbm_to_vmem [thread:$0]  (!%p1360_p11), %s1526_s1, 7296, %s1353_s22, [#allocation6], %s1281_s8, %s1281_s8, %s1282_s9  }
  0x29   : > { %p25_p2 = scmp.eq.s32.totalorder %s24_s26, 0  ;;  %p34_p1 = scmp.ne.s32.totalorder %s1274_s14, %s1270_s13 }
  0x2a   : > { %p35_p4 = scmp.eq.s32.totalorder %s1278_s15, 0  ;;  %p1032_p6 = scmp.lt.s32.totalorder %s1278_s15, 2 }
  0x2b   : > { %s1396_s17 = scalar_select %p25_p2, %s1274_s14, %s27_s25  }
  0x2c   : > { %p36_p8 = por %p35_p4, %p34_p1  ;;  %p1536_p10 = scmp.eq.s32.totalorder %s1330_s16, 1 }
  0x2d   : > { %s148_s27 = sand.u32 1, %s1274_s14   ;;  %s1007_s28 = smul.u32 384, %s1278_s15 }
  0x2e   : > { %p1400_p12 = por %p1536_p10, %p34_p1  ;;  %s1006_s29 = smul.u32 24, %s148_s27 }
  0x2f   : > { %p1406_p13 = pnand %p1032_p6, %p36_p8  ;;  %s1413_s25 = scalar_lea.hbm %s1525_s0, %s1007_s28 }
  0x30   : > { %s152_s30 = scalar_lea.vmem [#allocation2], %s1006_s29  ;;  %s149_s5 = scalar_lea.sflag [#allocation3], %s148_s27 }
  0x31   : > { %s160_s4 = sshll.u32 %s152_s30, 4  ;;  %s1178_s6 = scalar_lea.hbm %s1413_s25, 384  ;;  %s1415_s4 = int_to_ptr.vmem [resolvable:$true] %s160_s4 }
  0x32   : > { %p1179_p11 = scmp.ne.s32.totalorder %s1413_s25, %s1178_s6  ;;  %p1180_p0 = pneg %p1406_p13 }
  0x33   : > { %s1183_s9 = scalar_lea.hbm %s1525_s0, 768  ;;  %p1184_p7 = scmp.lt.u32.totalorder %s1413_s25, %s1525_s0 }
  0x34   : > { %p1181_p3 = pnand %p1180_p0, %p1179_p11  ;;  %p1185_p9 = scmp.lt.u32.totalorder %s1183_s9, %s1178_s6 }
  0x35   : > { %p1187_p1 = scmp.lt.u32.totalorder %s1178_s6, %s1413_s25 }
  0x36   : > { %p1182_p5 = pneg %p1181_p3  ;;  %p1186_p2 = por %p1185_p9, %p1184_p7 }
  0x38   : > { %p1188_p4 = por %p1187_p1, %p1186_p2 }
  0x3a   : > { %p1189_p6 = pnand %p1188_p4, %p1182_p5 }
  0x3c   : > { %1192 = shalt.err (!%p1189_p6)
}
  0x3d   : > { %s1193_s27 = scalar_lea.vmem %s1415_s4, 384  ;;  %s1283_s28 = smov [#allocation2]  }
  0x3e   : > { %p1194_p8 = scmp.ne.s32.totalorder %s1415_s4, %s1193_s27  ;;  %s1198_s29 = sshll.u32 %s1283_s28, 4  ;;  %s1199_s29 = int_to_ptr.vmem [resolvable:$false] %s1198_s29 }
  0x3f   : > { %s1200_s22 = scalar_lea.vmem %s1199_s29, 768  ;;  %p1201_p3 = scmp.lt.s32.totalorder %s1415_s4, %s1199_s29 }
  0x40   : > { %p1196_p10 = pnand %p1194_p8, %p1180_p0  ;;  %p1202_p7 = scmp.lt.s32.totalorder %s1200_s22, %s1193_s27 }
  0x42   : > { %p1197_p11 = pneg %p1196_p10  ;;  %p1203_p9 = por %p1202_p7, %p1201_p3 }
  0x44   : > { %p1204_p2 = pnand %p1203_p9, %p1197_p11 }
  0x46   : > { %1207 = shalt.err (!%p1204_p2)
}
  0x47   : > { %1026 = dma.hbm_to_vmem [thread:$0]  (!%p1406_p13), %s1413_s25, 384, %s1415_s4, %s149_s5  }
  0x48   : > { %p1539_p5 = scmp.ne.s32.totalorder %s1534_s20, 0 }
  0x49   : > { %s1445_s26 = sand.u32 (!%p1539_p5), 1, %s1270_s13   ;;  %p1540_p0 = scmp.ne.s32.totalorder (!%p1539_p5), %s1532_s18, 0 }
  0x4a   : > { %169 = sbr.rel (%p1539_p5) target bundleno = 383 (0x17f), region = 32  ;;  %s172_s6 = scalar_lea.sflag (!%p1539_p5), [#allocation3], %s1445_s26 }
  0x4b   : > { %s1008_s30 = smul.u32 (!%p1539_p5), 24, %s1445_s26 }
  0x4d   : > { %s1449_s7 = scalar_lea.vmem (!%p1539_p5), [#allocation2], %s1008_s30 }
  0x51   : > { %1253 = dma.done.wait (%p1540_p0), %s172_s6, 384  }
  0x52   : > { %1255 = vsyncadd (%p1540_p0), %s172_s6, 4294966912  ;;  %p1541_p13 = scmp.eq.s32.totalorder %s1330_s16, 0 }
  0x54   : > { %1257 = dma.done.wait (%p1541_p13), [#allocation6], 7296   ;;  %p1542_p1 = pmov %p1541_p13 }
  0x55   : > { %v1284_v0 = vmov 0   ;;  %v1074_v1 = vld [vmem:[#allocation5 + $0x4] ss:$12 sps:$4 sm:$0xff]   ;;  %v1076_v2 = vld [vmem:[#allocation5] ss:$12 sps:$4 sm:$0xff]   ;;  %vm607_vm0 = vcmask 1043456  }
  0x56   : > { %1259 = vsyncadd (%p1542_p1), [#allocation6], 4294960000  ;;  %693 = vmatprep.mubr.bf16.mxu1 %v1284_v0  ;;  %620 = vmatprep.subr.bf16.mxu0 %v1074_v1  ;;  %v1077_v3 = vld [vmem:[#allocation5 + $0x1c] ss:$12 sps:$4 sm:$0xff]   ;;  %v1079_v4 = vld [vmem:[#allocation5 + $0x184] ss:$12 sps:$4 sm:$0xff]  }
  0x57   : > { %621 = vmatpush1.bf16.msra.mxu0 %v1076_v2  ;;  %v1081_v5 = vld [vmem:[#allocation5 + $0x18] ss:$12 sps:$4 sm:$0xff]   ;;  %v1082_v6 = vld [vmem:[#allocation5 + $0x180] ss:$12 sps:$4 sm:$0xff]   ;;  %vm608_vm1 = vcmask 1044480   ;;  %v1285_v8 = vmov 65535   ;;  %661 = vmatprep.subr.bf16.mxu1 %v1079_v4 }
  0x58   : > { %622 = vmatprep.subr.bf16.mxu0 %v1077_v3  ;;  %v1083_v7 = vld [vmem:[#allocation5 + $0x34] ss:$12 sps:$4 sm:$0xff]   ;;  %v609_v9 = vsel %vm607_vm0, 4294967295, %v1285_v8  ;;  %v1085_v10 = vld [vmem:[#allocation5 + $0x19c] ss:$12 sps:$4 sm:$0xff]   ;;  %662 = vmatpush1.bf16.msra.mxu1 %v1082_v6  ;;  %vm603_vm2 = vcmask 334848  }
  0x59   : > { %v1087_v11 = vld [vmem:[#allocation5 + $0x30] ss:$12 sps:$4 sm:$0xff]   ;;  %v1088_v12 = vld [vmem:[#allocation5 + $0x198] ss:$12 sps:$4 sm:$0xff]   ;;  %663 = vmatprep.subr.bf16.mxu1 %v1085_v10  ;;  %v1459_v14 = vsel %vm608_vm1, %v609_v9, 0  ;;  %v1286_v60 = vmov 0.0  }
  0x5a   : > { %v1089_v13 = vld [vmem:[#allocation5 + $0x4c] ss:$12 sps:$4 sm:$0xff]   ;;  %v1091_v15 = vld [vmem:[#allocation5 + $0x1b4] ss:$12 sps:$4 sm:$0x1f]   ;;  %vm1287_vm3 = vmmov 0  }
  0x5b   : > { %623 = vmatpush1.bf16.msra.mxu0 %v1081_v5  ;;  %v1094_v16 = vld [vmem:[#allocation5 + $0x1b0] ss:$12 sps:$4 sm:$0x1f]   ;;  %v615_v17 = vand.u32 %v1091_v15, %v1459_v14  ;;  %v1093_v18 = vld [vmem:[#allocation5 + $0x48] ss:$12 sps:$4 sm:$0xff]   ;;  %s1009_s23 = smul.u32 12, %s1445_s26 }
  0x5c   : > { %624 = vmatprep.subr.bf16.mxu0 %v1083_v7  ;;  %664 = vmatpush1.bf16.msra.mxu1 %v1088_v12  ;;  %v612_v19 = vand.u32 %v1094_v16, %v1459_v14  ;;  %v1097_v20 = vld [vmem:[#allocation5 + $0xc8] ss:$12 sps:$4 sm:$0xff]   ;;  %v205_v21 = vld [vmem:[%s1449_s7 + $0x10] sm:$0xff]  ;;  %vm796_vm4 = vcmask 330752   ;;  %s1010_s4 = smul.u32 192, %s1330_s16  ;;  %s799_s11 = scalar_lea.sflag [#allocation4], %s1445_s26 }
  0x5d   : > { %665 = vmatprep.subr.bf16.mxu1 %v615_v17  ;;  %v1095_v22 = vld [vmem:[#allocation5 + $0x64] ss:$12 sps:$4 sm:$0xff]   ;;  %v1098_v23 = vld [vmem:[#allocation5 + $0x60] ss:$12 sps:$4 sm:$0xff]   ;;  %v1464_v24 = vpack.c.bf16 %v205_v21, %v205_v21  ;;  %v1099_v25 = vld [vmem:[#allocation5 + $0x8] ss:$12 sps:$4 sm:$0xff]  }
  0x5e   : > { %v1102_v26 = vld [vmem:[#allocation5 + $0xe0] ss:$12 sps:$4 sm:$0xff]   ;;  %v1100_v27 = vld [vmem:[#allocation5 + $0x7c] ss:$12 sps:$4 sm:$0xff]   ;;  %v1103_v28 = vld [vmem:[#allocation5 + $0x78] ss:$12 sps:$4 sm:$0xff]   ;;  %s1481_s10 = scalar_lea.hbm %s1528_s3, %s1010_s4 }
  0x5f   : > { %625 = vmatpush1.bf16.msra.mxu0 %v1087_v11  ;;  %v1104_v29 = vld [vmem:[#allocation5 + $0x20] ss:$12 sps:$4 sm:$0xff]   ;;  %v1107_v30 = vld [vmem:[#allocation5 + $0xf8] ss:$12 sps:$4 sm:$0xff]   ;;  %v1108_v32 = vld [vmem:[#allocation5 + $0x90] ss:$12 sps:$4 sm:$0xff]   ;;  %v287_v11 = vlaneseq }
  0x60   : > { %626 = vmatprep.subr.bf16.mxu0 %v1089_v13  ;;  %666 = vmatpush1.bf16.msra.mxu1 %v612_v19  ;;  %v1105_v31 = vld [vmem:[#allocation5 + $0x94] ss:$12 sps:$4 sm:$0xff]   ;;  %v1109_v33 = vld [vmem:[#allocation5 + $0x38] ss:$12 sps:$4 sm:$0xff]   ;;  %v1112_v34 = vld [vmem:[#allocation5 + $0x110] ss:$12 sps:$4 sm:$0xff]  }
  0x61   : > { %966 = vmatprep.subr.bf16.mxu1 %v1097_v20  ;;  %v1110_v35 = vld [vmem:[#allocation5 + $0xac] ss:$12 sps:$4 sm:$0xff]   ;;  %v1113_v36 = vld [vmem:[#allocation5 + $0xa8] ss:$12 sps:$4 sm:$0xff]   ;;  %v1114_v37 = vld [vmem:[#allocation5 + $0x50] ss:$12 sps:$4 sm:$0xff]  }
  0x62   : > { %v1117_v38 = vld [vmem:[#allocation5 + $0x128] ss:$12 sps:$4 sm:$0xff]   ;;  %v1115_v39 = vld [vmem:[#allocation5 + $0xc4] ss:$12 sps:$4 sm:$0xff]   ;;  %v1118_v41 = vld [vmem:[#allocation5 + $0xc0] ss:$12 sps:$4 sm:$0xff]  }
  0x63   : > { %627 = vmatpush1.bf16.msra.mxu0 %v1093_v18  ;;  %957 = vmatmul.mubr.msk.bf16.vlgmr.msra.gmra.mrb[0].mxu1 %vm603_vm2, %v1464_v24  ;;  %v1119_v40 = vld [vmem:[#allocation5 + $0x68] ss:$12 sps:$4 sm:$0xff]   ;;  %v1122_v42 = vld [vmem:[#allocation5 + $0x140] ss:$12 sps:$4 sm:$0xff]   ;;  %v1123_v44 = vld [vmem:[#allocation5 + $0xd8] ss:$12 sps:$4 sm:$0xff]  }
  0x64   : > { %628 = vmatprep.subr.bf16.mxu0 %v1095_v22  ;;  %967 = vmatpush3.bf16.msra.mxu1 %v1099_v25  ;;  %v1120_v43 = vld [vmem:[#allocation5 + $0xdc] ss:$12 sps:$4 sm:$0xff]   ;;  %v1124_v45 = vld [vmem:[#allocation5 + $0x80] ss:$12 sps:$4 sm:$0xff]   ;;  %v1127_v46 = vld [vmem:[#allocation5 + $0x158] ss:$12 sps:$4 sm:$0xff]  }
  0x65   : > { %968 = vmatprep.subr.bf16.mxu1 %v1102_v26  ;;  %v1125_v47 = vld [vmem:[#allocation5 + $0xf4] ss:$12 sps:$4 sm:$0xff]   ;;  %v1128_v48 = vld [vmem:[#allocation5 + $0xf0] ss:$12 sps:$4 sm:$0xff]   ;;  %v1129_v50 = vld [vmem:[#allocation5 + $0x98] ss:$12 sps:$4 sm:$0xff]  }
  0x66   : > { %v204_v49 = vld [vmem:[%s1449_s7 + $0x8] sm:$0xff]  ;;  %v203_v56 = vld [vmem:[%s1449_s7] sm:$0xff]  ;;  %v288_v12 = vshrl.u32 %v287_v11, 7  ;;  %s201_s25 = scalar_lea.vmem [#allocation7], %s1009_s23  ;;  %s1288_s16 = smov [#allocation7]  }
  0x67   : > { %629 = vmatpush1.bf16.msra.mxu0 %v1098_v23  ;;  %v207_v51 = vpack.c.bf16 %v204_v49, %v204_v49  ;;  %v1132_v52 = vld [vmem:[#allocation5 + $0x170] ss:$12 sps:$4 sm:$0xff]   ;;  %v1130_v53 = vld [vmem:[#allocation5 + $0x10c] ss:$12 sps:$4 sm:$0xff]   ;;  %v1133_v54 = vld [vmem:[#allocation5 + $0x108] ss:$12 sps:$4 sm:$0xff]   ;;  %v206_v58 = vpack.c.bf16 %v203_v56, %v203_v56 }
  0x68   : > { %630 = vmatprep.subr.bf16.mxu0 %v1100_v27  ;;  %969 = vmatpush3.bf16.msra.mxu1 %v1104_v29  ;;  %v1134_v55 = vld [vmem:[#allocation5 + $0xb0] ss:$12 sps:$4 sm:$0xff]   ;;  %v1138_v59 = vld [vmem:[#allocation5 + $0x188] ss:$12 sps:$4 sm:$0xff]   ;;  %v1137_v61 = vld [vmem:[#allocation5 + $0x120] ss:$12 sps:$4 sm:$0xff]  }
  0x69   : > { %970 = vmatprep.subr.bf16.mxu1 %v1107_v30  ;;  %734 = vmatprep.mubr.bf16.mxu1 %v207_v51  ;;  %v1135_v57 = vld [vmem:[#allocation5 + $0x124] ss:$12 sps:$4 sm:$0xff]   ;;  %v1139_v62 = vld [vmem:[#allocation5 + $0x13c] ss:$12 sps:$4 sm:$0xff]   ;;  %v1142_v63 = vld [vmem:[#allocation5 + $0x1a0] ss:$12 sps:$4 sm:$0xff]  }
  0x6a   : > { %652 = vmatprep.mubr.bf16.mxu0 %v207_v51  ;;  %v1146_v0 = vld [vmem:[#allocation5 + $0x1b8] ss:$12 sps:$4 sm:$0x1f]   ;;  %v1143_v2 = vld [vmem:[#allocation5 + $0x154] ss:$12 sps:$4 sm:$0xff]   ;;  %v297_v15 = vsub.s32 2, %v288_v12 }
  0x6b   : > { %631 = vmatpush1.bf16.msra.mxu0 %v1103_v28  ;;  %v1141_v1 = vld [vmem:[#allocation5 + $0x138] ss:$12 sps:$4 sm:$0xff]   ;;  %v618_v3 = vand.u32 %v1146_v0, %v1459_v14  ;;  %v1145_v4 = vld [vmem:[#allocation5 + $0x150] ss:$12 sps:$4 sm:$0xff]   ;;  %v1149_v6 = vld [vmem:[#allocation5 + $0x168] ss:$12 sps:$4 sm:$0xff]  }
  0x6c   : > { %632 = vmatprep.subr.bf16.mxu0 %v1105_v31  ;;  %971 = vmatpush3.bf16.msra.mxu1 %v1109_v33  ;;  %v1147_v5 = vld [vmem:[#allocation5 + $0x16c] ss:$12 sps:$4 sm:$0xff]   ;;  %v285_v18 = vld [vmem:[%s1527_s2] sm:$0x7]  ;;  %v289_v22 = vsub.s32 0, %v288_v12  ;;  %v293_v23 = vsub.s32 1, %v288_v12 }
  0x6d   : > { %972 = vmatprep.subr.bf16.mxu1 %v1112_v34  ;;  %v298_v20 = vrot.slane %v285_v18, %v297_v15  ;;  %s813_s5 = sshll.u32 %s201_s25, 4  ;;  %s1212_s28 = sshll.u32 %s1288_s16, 4  ;;  %s1483_s5 = int_to_ptr.vmem [resolvable:$true] %s813_s5  ;;  %s1213_s28 = int_to_ptr.vmem [resolvable:$false] %s1212_s28 }
  0x6e   : > { %v290_v27 = vrot.slane %v285_v18, %v289_v22  ;;  %v294_v30 = vrot.slane %v285_v18, %v293_v23  ;;  %s1208_s27 = scalar_lea.vmem %s1483_s5, 192  ;;  %s1214_s29 = scalar_lea.vmem %s1213_s28, 384 }
  0x6f   : > { %633 = vmatpush1.bf16.msra.mxu0 %v1108_v32  ;;  %p1209_p4 = scmp.ne.s32.totalorder %s1483_s5, %s1208_s27  ;;  %p1215_p10 = scmp.lt.s32.totalorder %s1483_s5, %s1213_s28 }
  0x70   : > { %634 = vmatprep.subr.bf16.mxu0 %v1110_v35  ;;  %973 = vmatpush3.bf16.msra.mxu1 %v1114_v37  ;;  %p1216_p11 = scmp.lt.s32.totalorder %s1214_s29, %s1208_s27 }
  0x71   : > { %974 = vmatprep.subr.bf16.mxu1 %v1117_v38  ;;  %p1210_p6 = pnand %p1209_p4, %p1400_p12 }
  0x72   : > { %p1217_p3 = por %p1216_p11, %p1215_p10 }
  0x73   : > { %635 = vmatpush1.bf16.msra.mxu0 %v1113_v36  ;;  %p1211_p8 = pneg %p1210_p6 }
  0x74   : > { %636 = vmatprep.subr.bf16.mxu0 %v1115_v39  ;;  %975 = vmatpush3.bf16.msra.mxu1 %v1119_v40 }
  0x75   : > { %976 = vmatprep.subr.bf16.mxu1 %v1122_v42  ;;  %p1218_p7 = pnand %p1217_p3, %p1211_p8 }
  0x77   : > { %637 = vmatpush1.bf16.msra.mxu0 %v1118_v41 }
  0x78   : > { %638 = vmatprep.subr.bf16.mxu0 %v1120_v43  ;;  %977 = vmatpush3.bf16.msra.mxu1 %v1124_v45 }
  0x79   : > { %978 = vmatprep.subr.bf16.mxu1 %v1127_v46 }
  0x7b   : > { %639 = vmatpush1.bf16.msra.mxu0 %v1123_v44 }
  0x7c   : > { %640 = vmatprep.subr.bf16.mxu0 %v1125_v47  ;;  %979 = vmatpush3.bf16.msra.mxu1 %v1129_v50 }
  0x7d   : > { %980 = vmatprep.subr.bf16.mxu1 %v1132_v52 }
  0x7f   : > { %641 = vmatpush1.bf16.msra.mxu0 %v1128_v48 }
  0x80   : > { %642 = vmatprep.subr.bf16.mxu0 %v1130_v53  ;;  %981 = vmatpush3.bf16.msra.mxu1 %v1134_v55 }
  0x81   : > { %992 = vmatprep.subr.bf16.mxu1 %v1286_v60 }
  0x83   : > { %643 = vmatpush1.bf16.msra.mxu0 %v1133_v54  ;;  %735 = vmatmul.mubr.bf16.vlgmr.msra.gmra.mrb[4].mxu1 %v206_v58 }
  0x84   : > { %644 = vmatprep.subr.bf16.mxu0 %v1135_v57  ;;  %993 = vmatpush3.bf16.msra.mxu1 %v1138_v59 }
  0x85   : > { %998 = vmatprep.mubr.msk.bf16.mxu1 %vm1287_vm3, %v1286_v60  ;;  %994 = vmatprep.subr.bf16.mxu1 %v1286_v60 }
  0x87   : > { %645 = vmatpush1.bf16.msra.mxu0 %v1137_v61 }
  0x88   : > { %646 = vmatprep.subr.bf16.mxu0 %v1139_v62  ;;  %995 = vmatpush3.bf16.msra.mxu1 %v1142_v63 }
  0x89   : > { %996 = vmatprep.subr.bf16.mxu1 %v1286_v60 }
  0x8b   : > { %647 = vmatpush1.bf16.msra.mxu0 %v1141_v1 }
  0x8c   : > { %648 = vmatprep.subr.bf16.mxu0 %v1143_v2  ;;  %997 = vmatpush3.bf16.msra.mxu1 %v618_v3 }
  0x8f   : > { %649 = vmatpush1.bf16.msra.mxu0 %v1145_v4  ;;  %999 = vmatmul.mubr.msk.bf16.vlgmr.msra.gmra.mrb[8].mxu1 %vm603_vm2, %v1464_v24 }
  0x90   : > { %650 = vmatprep.subr.bf16.mxu0 %v1147_v5 }
  0x93   : > { %651 = vmatpush1.bf16.msra.mxu0 %v1149_v6 }
  0x96   : > { %653 = vmatmul.mubr.bf16.vlgmr.msra.gmra.mrb[0].mxu0 %v206_v58 }
 0x136   : > { %v695_v7 = vpop.f32.mrb[0].mxu1 }
 0x137   : > { %v697_v8 = vpop.f32.mrb[1].mxu1 }
 0x138   : > { %v699_v9 = vpop.f32.mrb[2].mxu1 }
 0x139   : > { %v700_v10 = vpop.f32.mrb[3].mxu1 }
 0x156   : > { %v982_v13 = vpop.f32.mrb[4].mxu1 }
 0x157   : > { %v983_v14 = vpop.f32.mrb[5].mxu1 }
 0x158   : > { %v984_v16 = vadd.f32 %v983_v14, %v982_v13  ;;  %v985_v17 = vpop.f32.mrb[6].mxu1 }
 0x159   : > { %v986_v19 = vpop.f32.mrb[7].mxu1 }
 0x15a   : > { %v737_v21 = vadd.f32 %v984_v16, %v298_v20 }
 0x162   : > { %v776_v24 = vpop.f32.mrb[8].mxu1 }
 0x163   : > { %v777_v25 = vadd.f32 %v776_v24, %v737_v21  ;;  %v1000_v26 = vpop.f32.mrb[9].mxu1 }
 0x164   : > { %v779_v28 = vpop.f32.mrb[10].mxu1 }
 0x165   : > { %v965_v29 = vpack.c.bf16 %v777_v25, %v777_v25  ;;  %v1001_v31 = vpop.f32.mrb[11].mxu1 }
 0x167   : > { %797 = vst.msk [vmem:[%s201_s25 + $0x8] sm:$0xf] %vm796_vm4, %v965_v29 }
 0x169   : > { %v654_v32 = vpop.f32.mrb[0].mxu0 }
 0x16a   : > { %v655_v33 = vadd.f32 %v654_v32, %v290_v27  ;;  %v656_v34 = vpop.f32.mrb[1].mxu0 }
 0x16b   : > { %v657_v35 = vadd.f32 %v656_v34, %v294_v30  ;;  %v658_v36 = vpop.f32.mrb[2].mxu0 }
 0x16c   : > { %v696_v37 = vadd.f32 %v695_v7, %v655_v33  ;;  %v659_v38 = vpop.f32.mrb[3].mxu0 }
 0x16d   : > { %v698_v39 = vadd.f32 %v697_v8, %v657_v35 }
 0x16f   : > { %v964_v40 = vpack.c.bf16 %v698_v39, %v696_v37 }
 0x171   : > { %795 = vst [vmem:[%s201_s25] sm:$0xff] %v964_v40 }
 0x172   : > { %1221 = shalt.err (!%p1218_p7)
}
 0x173   : > { %s1222_s22 = scalar_lea.hbm %s1481_s10, 192  ;;  %s1226_s6 = scalar_lea.hbm %s1528_s3, 384 }
 0x174   : > { %p1223_p9 = scmp.ne.s32.totalorder %s1481_s10, %s1222_s22  ;;  %p1227_p0 = scmp.lt.u32.totalorder %s1481_s10, %s1528_s3 }
 0x175   : > { %p1228_p13 = scmp.lt.u32.totalorder %s1226_s6, %s1222_s22  ;;  %p1230_p4 = scmp.lt.u32.totalorder %s1222_s22, %s1481_s10 }
 0x176   : > { %p1224_p2 = pnand %p1223_p9, %p1400_p12 }
 0x177   : > { %p1229_p1 = por %p1228_p13, %p1227_p0 }
 0x178   : > { %p1225_p5 = pneg %p1224_p2 }
 0x179   : > { %p1231_p6 = por %p1230_p4, %p1229_p1 }
 0x17b   : > { %p1232_p8 = pnand %p1231_p6, %p1225_p5 }
 0x17d   : > { %1235 = shalt.err (!%p1232_p8)
}
 0x17e   : > { %1017 = dma.vmem_to_hbm [thread:$0]  (%p1400_p12), %s1483_s5, 192, %s1481_s10, %s799_s11  }
 0x17f PF: > { %s825_s20 = sand.u32 1, %s1266_s12   ;;  %p1543_p10 = scmp.ne.s32.totalorder %s1533_s19, 0 }
 0x180   : > { %p1544_p11 = scmp.ge.s32.totalorder %s1278_s15, 2  ;;  %s826_s23 = scalar_lea.sflag [#allocation4], %s825_s20 }
 0x182   : > { %p1028_p3 = pnand %p1544_p11, %p1543_p10 }
 0x184   : > { %1261 = dma.done.wait (!%p1028_p3), %s826_s23, 192  }
 0x185   : > { %1263 = vsyncadd (!%p1028_p3), %s826_s23, 4294967104  ;;  %p17_p7 = scmp.ge.s32.totalorder %s1365_s24, 4   ;;  %s1545_s12 = smov %s1270_s13 }
 0x186   : > { %s1546_s13 = smov %s1274_s14  ;;  %s1547_s14 = smov %s1396_s17 }
 0x187   : > { %s1548_s15 = smov %s1365_s24  ;;  %19 = sbr.rel (!%p17_p7) target bundleno = 6 (0x6), region = 81 }
 0x18e   :  { %831 = vsyncpa [#allocation3], 1 }
 0x18f   :  { %833 = vsyncpa [#allocation3 + $0x1], 1 }
 0x190   :  { %834 = vsyncpa [#allocation6], 1 }
 0x191   :  { %835 = vsyncpa [#allocation4], 1 }
 0x192   :  { %837 = vsyncpa [#allocation4 + $0x1], 1 }

</bundles_post_ra>
